<compile_context>
chip_gen: v6e
topology: v6e:2x2x1
jax: 0.10.0
libtpu: 0.0.40
codegen_flags: <defaults>
</compile_context>

<pallas_src>
import jax
import jax.numpy as jnp
from jax.experimental import pallas as pl
from jax.experimental.pallas import tpu as pltpu

_IN = 28 * 28      # 784
_HID = 30
_OUT = 10
_HID_PAD = 128     # lane-dense hidden dim
_OUT_PAD = 128     # lane-dense output dim (unmasked stores)


def _mlp_kernel(x_ref, w1_ref, b1_ref, w2_ref, b2_ref, o_ref):
    # x:  (TB, 784)  bf16      w1: (784, 128) bf16     w2: (128, 128) bf16
    # b1: (1, 128)   f32       b2: (1, 128)   f32      o:  (TB, 128)  f32
    h = jnp.dot(x_ref[...], w1_ref[...], preferred_element_type=jnp.float32)
    h = jnp.maximum(h + b1_ref[...], 0.0)                      # bias + ReLU (VPU)
    out = jnp.dot(h.astype(jnp.bfloat16), w2_ref[...],
                  preferred_element_type=jnp.float32)
    o_ref[...] = out + b2_ref[...]


def _round_up(v, m):
    return (v + m - 1) // m * m


@jax.jit
def mnist_forward(x_nchw, w1, b1, w2, b2):
    """x_nchw: (B, 1, 28, 28) float32 -> logits (B, 10) float32."""
    B = x_nchw.shape[0]
    x_flat = x_nchw.reshape(B, -1).astype(jnp.bfloat16)        # (B, 784) bf16

    # Batch tile: large enough to pipeline HBM->VMEM DMA against MXU work,
    # small enough that the double-buffered tile fits v7x's 64 MiB VMEM
    # (and v5e's 16 MiB default scoped limit) with lots of headroom.
    TB = min(512, _round_up(B, 8))
    B_pad = _round_up(B, TB)
    if B_pad != B:
        x_flat = jnp.pad(x_flat, ((0, B_pad - B), (0, 0)))

    # Zero-pad feature dims to 128 lanes; slice back to 10 at the end.
    w1_p = jnp.zeros((_IN, _HID_PAD), jnp.bfloat16).at[:, :_HID].set(
        w1.astype(jnp.bfloat16))
    w2_p = jnp.zeros((_HID_PAD, _OUT_PAD), jnp.bfloat16).at[:_HID, :_OUT].set(
        w2.astype(jnp.bfloat16))
    b1_p = jnp.zeros((1, _HID_PAD), jnp.float32).at[0, :_HID].set(b1)
    b2_p = jnp.zeros((1, _OUT_PAD), jnp.float32).at[0, :_OUT].set(b2)

    grid = (B_pad // TB,)
    flops = 2 * B_pad * (_IN * _HID_PAD + _HID_PAD * _OUT_PAD)
    bytes_accessed = (x_flat.size * 2 + w1_p.size * 2 + w2_p.size * 2
                      + b1_p.size * 4 + b2_p.size * 4 + B_pad * _OUT_PAD * 4)

    out_padded = pl.pallas_call(
        _mlp_kernel,
        out_shape=jax.ShapeDtypeStruct((B_pad, _OUT_PAD), jnp.float32),
        grid=grid,
        in_specs=[
            pl.BlockSpec((TB, _IN), lambda i: (i, 0)),             # x tile (pipelined)
            pl.BlockSpec((_IN, _HID_PAD), lambda i: (0, 0)),       # w1 (VMEM-resident)
            pl.BlockSpec((1, _HID_PAD), lambda i: (0, 0)),         # b1
            pl.BlockSpec((_HID_PAD, _OUT_PAD), lambda i: (0, 0)),  # w2
            pl.BlockSpec((1, _OUT_PAD), lambda i: (0, 0)),         # b2
        ],
        out_specs=pl.BlockSpec((TB, _OUT_PAD), lambda i: (i, 0)),
        compiler_params=pltpu.CompilerParams(
            dimension_semantics=("parallel",)),
        cost_estimate=pl.CostEstimate(
            flops=flops, transcendentals=0, bytes_accessed=bytes_accessed),
    )(x_flat, w1_p, b1_p, w2_p, b2_p)

    return out_padded[:B, :_OUT]


def init_params(key):
    """Deterministic init mirroring torch.nn.Linear default (U[-1/sqrt(fan_in), ...])."""
    k1, k2, k3, k4 = jax.random.split(key, 4)
    bound1 = 1.0 / jnp.sqrt(jnp.float32(_IN))
    bound2 = 1.0 / jnp.sqrt(jnp.float32(_HID))
    w1 = jax.random.uniform(k1, (_IN, _HID), jnp.float32, -bound1, bound1)
    b1 = jax.random.uniform(k2, (_HID,), jnp.float32, -bound1, bound1)
    w2 = jax.random.uniform(k3, (_HID, _OUT), jnp.float32, -bound2, bound2)
    b2 = jax.random.uniform(k4, (_OUT,), jnp.float32, -bound2, bound2)
    return w1, b1, w2, b2


if __name__ == "__main__":
    key = jax.random.PRNGKey(0)
    k_x, k_p = jax.random.split(key)

    B = 2
    x = jax.random.normal(k_x, (B, 1, 28, 28), jnp.float32)   # NCHW, like PyTorch MNIST
    w1, b1, w2, b2 = init_params(k_p)

    logits = mnist_forward(x, w1, b1, w2, b2)
    logits = jax.block_until_ready(logits)

    # Pure-JAX f32 reference (kernel uses bf16 inputs -> looser tolerance).
    x_flat = x.reshape(B, -1)
    ref = jnp.maximum(x_flat @ w1 + b1, 0.0) @ w2 + b2
    assert logits.shape == (B, 10)
    assert jnp.allclose(logits, ref, atol=2e-2, rtol=2e-2), (logits, ref)

    print("KERNEL_OK")
</pallas_src>

<mosaic_0001>
module attributes {stable_mosaic.version = 11 : i64} {
  func.func @_mlp_kernel(%arg0: i32, %arg1: memref<8x784xbf16, #tpu.memory_space<vmem>>, %arg2: memref<784x128xbf16, #tpu.memory_space<vmem>>, %arg3: memref<1x128xf32, #tpu.memory_space<vmem>>, %arg4: memref<128x128xbf16, #tpu.memory_space<vmem>>, %arg5: memref<1x128xf32, #tpu.memory_space<vmem>>, %arg6: memref<8x128xf32, #tpu.memory_space<vmem>>) attributes {dimension_semantics = [#tpu.dimension_semantics<parallel>], iteration_bounds = array<i64: 1>, scalar_prefetch = 0 : i64, scratch_operands = 0 : i64, tpu.core_type = #tpu.core_type<tc>, window_params = [{transform_indices = @transform_0, window_bounds = array<i64: 8, 784>}, {pipeline_mode = #tpu.pipeline_mode<synchronous>, transform_indices = @transform_1, window_bounds = array<i64: 784, 128>}, {pipeline_mode = #tpu.pipeline_mode<synchronous>, transform_indices = @transform_2, window_bounds = array<i64: 1, 128>}, {pipeline_mode = #tpu.pipeline_mode<synchronous>, transform_indices = @transform_3, window_bounds = array<i64: 128, 128>}, {pipeline_mode = #tpu.pipeline_mode<synchronous>, transform_indices = @transform_4, window_bounds = array<i64: 1, 128>}, {transform_indices = @transform_5, window_bounds = array<i64: 8, 128>}]} {
    %c0 = arith.constant 0 : index
    %c0_0 = arith.constant 0 : index
    %0 = vector.load %arg1[%c0, %c0_0] : memref<8x784xbf16, #tpu.memory_space<vmem>>, vector<8x784xbf16>
    %c0_1 = arith.constant 0 : index
    %c0_2 = arith.constant 0 : index
    %1 = vector.load %arg2[%c0_1, %c0_2] : memref<784x128xbf16, #tpu.memory_space<vmem>>, vector<784x128xbf16>
    %cst = arith.constant dense<0.000000e+00> : vector<8x128xf32>
    %2 = tpu.matmul %0, %1, %cst {dimension_numbers = #tpu.dot_dimension_numbers<[1], [0], [0], [1], [0, 0, 1, 1], [], []>} : vector<8x784xbf16>, vector<784x128xbf16>, vector<8x128xf32> -> vector<8x128xf32>
    %c0_3 = arith.constant 0 : index
    %c0_4 = arith.constant 0 : index
    %3 = vector.load %arg3[%c0_3, %c0_4] : memref<1x128xf32, #tpu.memory_space<vmem>>, vector<1x128xf32>
    %4 = vector.broadcast %3 : vector<1x128xf32> to vector<8x128xf32>
    %5 = arith.addf %2, %4 : vector<8x128xf32>
    %cst_5 = arith.constant 0.000000e+00 : f32
    %6 = vector.broadcast %cst_5 : f32 to vector<8x128xf32>
    %7 = arith.maximumf %5, %6 : vector<8x128xf32>
    %8 = arith.truncf %7 : vector<8x128xf32> to vector<8x128xbf16>
    %c0_6 = arith.constant 0 : index
    %c0_7 = arith.constant 0 : index
    %9 = vector.load %arg4[%c0_6, %c0_7] : memref<128x128xbf16, #tpu.memory_space<vmem>>, vector<128x128xbf16>
    %cst_8 = arith.constant dense<0.000000e+00> : vector<8x128xf32>
    %10 = tpu.matmul %8, %9, %cst_8 {dimension_numbers = #tpu.dot_dimension_numbers<[1], [0], [0], [1], [0, 0, 1, 1], [], []>} : vector<8x128xbf16>, vector<128x128xbf16>, vector<8x128xf32> -> vector<8x128xf32>
    %c0_9 = arith.constant 0 : index
    %c0_10 = arith.constant 0 : index
    %11 = vector.load %arg5[%c0_9, %c0_10] : memref<1x128xf32, #tpu.memory_space<vmem>>, vector<1x128xf32>
    %12 = vector.broadcast %11 : vector<1x128xf32> to vector<8x128xf32>
    %13 = arith.addf %10, %12 : vector<8x128xf32>
    %c0_11 = arith.constant 0 : index
    %c0_12 = arith.constant 0 : index
    %14 = vector.load %arg6[%c0_11, %c0_12] : memref<8x128xf32, #tpu.memory_space<vmem>>, vector<8x128xf32>
    tpu.vector_store %arg6[%c0_11, %c0_12], %13 {strides = array<i32>} : memref<8x128xf32, #tpu.memory_space<vmem>>, vector<8x128xf32>,
    return
  }
  func.func @transform_0(%arg0: i32) -> (i32, i32) {
    %c0_i32 = arith.constant 0 : i32
    %c0_i32_0 = arith.constant 0 : i32
    return %arg0, %c0_i32 : i32, i32
  }
  func.func @transform_1(%arg0: i32) -> (i32, i32) {
    %c0_i32 = arith.constant 0 : i32
    %c0_i32_0 = arith.constant 0 : i32
    %c0_i32_1 = arith.constant 0 : i32
    return %c0_i32, %c0_i32_0 : i32, i32
  }
  func.func @transform_2(%arg0: i32) -> (i32, i32) {
    %c0_i32 = arith.constant 0 : i32
    %c0_i32_0 = arith.constant 0 : i32
    %c0_i32_1 = arith.constant 0 : i32
    return %c0_i32, %c0_i32_0 : i32, i32
  }
  func.func @transform_3(%arg0: i32) -> (i32, i32) {
    %c0_i32 = arith.constant 0 : i32
    %c0_i32_0 = arith.constant 0 : i32
    %c0_i32_1 = arith.constant 0 : i32
    return %c0_i32, %c0_i32_0 : i32, i32
  }
  func.func @transform_4(%arg0: i32) -> (i32, i32) {
    %c0_i32 = arith.constant 0 : i32
    %c0_i32_0 = arith.constant 0 : i32
    %c0_i32_1 = arith.constant 0 : i32
    return %c0_i32, %c0_i32_0 : i32, i32
  }
  func.func @transform_5(%arg0: i32) -> (i32, i32) {
    %c0_i32 = arith.constant 0 : i32
    %c0_i32_0 = arith.constant 0 : i32
    return %arg0, %c0_i32 : i32, i32
  }
}

</mosaic_0001>

<bundles_post_ra>
// kernel: mnist_forward.1
= control target key start
LH: loop header
LB: loop body
LE: loop exit
PB: predicated region body
PF: predicated region fallthrough
CT: control target
= control target key end

     0   :  { %v966_v41 = vmov 0.0   ;;  %vm967_vm0 = vmmov 0   ;;  %vm448_vm1 = vcmask 130048   ;;  %s1203_s1 = inlined_call_operand.vmem [shape: bf16[784,128], index: 1, kind: input, shape index: {}]   ;;  %s1204_s0 = inlined_call_operand.vmem [shape: bf16[8,784], index: 0, kind: input, shape index: {}]   ;;  %s1205_s3 = inlined_call_operand.vmem [shape: bf16[128,128], index: 3, kind: input, shape index: {}]   ;;  %s1206_s2 = inlined_call_operand.vmem [shape: f32[1,128], index: 2, kind: input, shape index: {}]   ;;  %s1207_s4 = inlined_call_operand.vmem [shape: f32[1,128], index: 4, kind: input, shape index: {}]   ;;  %s1208_s5 = inlined_call_operand.vmem [shape: f32[8,128], index: 5, kind: output, shape index: {}]  }
   0x1   :  { %v902_v0 = vld [vmem:[%s1203_s1 + $0x78] sm:$0xff]   ;;  %v906_v4 = vld [vmem:[%s1203_s1 + $0x70] sm:$0xff]   ;;  %v910_v8 = vld [vmem:[%s1203_s1 + $0x68] sm:$0xff]  }
   0x2   :  { %v903_v1 = vld [vmem:[%s1203_s1 + $0x38] sm:$0xff]   ;;  %797 = vmatprep.subr.bf16.mxu0 %v902_v0  ;;  %v907_v5 = vld [vmem:[%s1203_s1 + $0x30] sm:$0xff]   ;;  %v911_v9 = vld [vmem:[%s1203_s1 + $0x28] sm:$0xff]  }
   0x3   :  { %v904_v2 = vld [vmem:[%s1203_s1 + $0xf8] sm:$0xff]   ;;  %798 = vmatpush3.bf16.msra.mxu0 %v903_v1  ;;  %v908_v6 = vld [vmem:[%s1203_s1 + $0xf0] sm:$0xff]   ;;  %v912_v10 = vld [vmem:[%s1203_s1 + $0xe8] sm:$0xff]  }
   0x4   :  { %v905_v3 = vld [vmem:[%s1203_s1 + $0xb8] sm:$0xff]   ;;  %819 = vmatprep.subr.bf16.mxu1 %v904_v2  ;;  %799 = vmatprep.subr.bf16.mxu0 %v906_v4  ;;  %v909_v7 = vld [vmem:[%s1203_s1 + $0xb0] sm:$0xff]   ;;  %v913_v11 = vld [vmem:[%s1203_s1 + $0xa8] sm:$0xff]  }
   0x5   :  { %820 = vmatpush3.bf16.msra.mxu1 %v905_v3  ;;  %v914_v12 = vld [vmem:[%s1203_s1 + $0x60] sm:$0xff]   ;;  %v918_v16 = vld [vmem:[%s1203_s1 + $0x58] sm:$0xff]   ;;  %v922_v20 = vld [vmem:[%s1203_s1 + $0x50] sm:$0xff]  }
   0x6   :  { %821 = vmatprep.subr.bf16.mxu1 %v908_v6  ;;  %v915_v13 = vld [vmem:[%s1203_s1 + $0x20] sm:$0xff]   ;;  %v919_v17 = vld [vmem:[%s1203_s1 + $0x18] sm:$0xff]   ;;  %v923_v21 = vld [vmem:[%s1203_s1 + $0x10] sm:$0xff]  }
   0x7   :  { %800 = vmatpush3.bf16.msra.mxu0 %v907_v5  ;;  %v916_v14 = vld [vmem:[%s1203_s1 + $0xe0] sm:$0xff]   ;;  %v920_v18 = vld [vmem:[%s1203_s1 + $0xd8] sm:$0xff]   ;;  %v924_v22 = vld [vmem:[%s1203_s1 + $0xd0] sm:$0xff]  }
   0x8   :  { %801 = vmatprep.subr.bf16.mxu0 %v910_v8  ;;  %v917_v15 = vld [vmem:[%s1203_s1 + $0xa0] sm:$0xff]   ;;  %v921_v19 = vld [vmem:[%s1203_s1 + $0x98] sm:$0xff]   ;;  %v925_v23 = vld [vmem:[%s1203_s1 + $0x90] sm:$0xff]  }
   0x9   :  { %822 = vmatpush3.bf16.msra.mxu1 %v909_v7  ;;  %v926_v24 = vld [vmem:[%s1203_s1 + $0x48] sm:$0xff]   ;;  %v930_v28 = vld [vmem:[%s1203_s1 + $0x40] sm:$0xff]   ;;  %v937_v35 = vld [vmem:[%s1203_s1 + $0x178] sm:$0xff]  }
   0xa   :  { %823 = vmatprep.subr.bf16.mxu1 %v912_v10  ;;  %v927_v25 = vld [vmem:[%s1203_s1 + $0x8] sm:$0xff]   ;;  %v931_v29 = vld [vmem:[%s1203_s1] sm:$0xff]   ;;  %v940_v39 = vld [vmem:[%s1203_s1 + $0x138] sm:$0xff]  }
   0xb   :  { %802 = vmatpush3.bf16.msra.mxu0 %v911_v9  ;;  %v928_v26 = vld [vmem:[%s1203_s1 + $0xc8] sm:$0xff]   ;;  %v932_v30 = vld [vmem:[%s1203_s1 + $0xc0] sm:$0xff]   ;;  %v941_v40 = vld [vmem:[%s1203_s1 + $0x170] sm:$0xff]  }
   0xc   :  { %803 = vmatprep.subr.bf16.mxu0 %v914_v12  ;;  %v929_v27 = vld [vmem:[%s1203_s1 + $0x88] sm:$0xff]   ;;  %v21_v31 = vld [vmem:[%s1204_s0] sm:$0xff]  ;;  %v942_v42 = vld [vmem:[%s1203_s1 + $0x130] sm:$0xff]  }
   0xd   :  { %824 = vmatpush3.bf16.msra.mxu1 %v913_v11  ;;  %v731_v32 = vcombine.low %v21_v31, %v21_v31  ;;  %v732_v33 = vcombine.high %v21_v31, %v21_v31  ;;  %v936_v34 = vld [vmem:[%s1203_s1 + $0x80] sm:$0xff]   ;;  %v22_v36 = vld [vmem:[%s1204_s0 + $0x8] sm:$0xff]  ;;  %v947_v47 = vld [vmem:[%s1203_s1 + $0x158] sm:$0xff]  }
   0xe   :  { %825 = vmatprep.subr.bf16.mxu1 %v916_v14  ;;  %v733_v37 = vcombine.low %v22_v36, %v22_v36  ;;  %v734_v38 = vcombine.high %v22_v36, %v22_v36  ;;  %v943_v43 = vld [vmem:[%s1203_s1 + $0x168] sm:$0xff]   ;;  %v945_v45 = vld [vmem:[%s1203_s1 + $0x160] sm:$0xff]   ;;  %v948_v48 = vld [vmem:[%s1203_s1 + $0x118] sm:$0xff]  }
   0xf   :  { %804 = vmatpush3.bf16.msra.mxu0 %v915_v13  ;;  %484 = vmatprep.mubr.bf16.mxu0 %v732_v33  ;;  %v944_v44 = vld [vmem:[%s1203_s1 + $0x128] sm:$0xff]   ;;  %v946_v46 = vld [vmem:[%s1203_s1 + $0x120] sm:$0xff]   ;;  %v949_v49 = vld [vmem:[%s1203_s1 + $0x150] sm:$0xff]  }
  0x10   :  { %805 = vmatprep.subr.bf16.mxu0 %v918_v16  ;;  %524 = vmatprep.mubr.bf16.mxu1 %v734_v38  ;;  %v955_v50 = vld [vmem:[%s1203_s1 + $0x180] sm:$0xff]   ;;  %v23_v51 = vld [vmem:[%s1204_s0 + $0x10] sm:$0xff]  ;;  %v935_v52 = vld [vmem:[%s1204_s0 + $0x18] ss:$0 sps:$4 sm:$0xff]  }
  0x11   :  { %826 = vmatpush3.bf16.msra.mxu1 %v917_v15  ;;  %v736_v53 = vcombine.high %v23_v51, %v23_v51  ;;  %v950_v54 = vld [vmem:[%s1203_s1 + $0x110] sm:$0xff]   ;;  %v951_v55 = vld [vmem:[%s1203_s1 + $0x148] sm:$0xff]   ;;  %v953_v57 = vld [vmem:[%s1203_s1 + $0x140] sm:$0xff]   ;;  %v735_v59 = vcombine.low %v23_v51, %v23_v51 }
  0x12   :  { %827 = vmatprep.subr.bf16.mxu1 %v920_v18  ;;  %v952_v56 = vld [vmem:[%s1203_s1 + $0x108] sm:$0xff]   ;;  %v954_v58 = vld [vmem:[%s1203_s1 + $0x100] sm:$0xff]   ;;  %v958_v60 = vld [vmem:[%s1205_s3 + $0x38] sm:$0xff]  }
  0x13   :  { %806 = vmatpush3.bf16.msra.mxu0 %v919_v17  ;;  %v959_v61 = vld [vmem:[%s1205_s3 + $0x30] sm:$0xff]   ;;  %v960_v62 = vld [vmem:[%s1205_s3 + $0x28] sm:$0xff]   ;;  %v961_v63 = vld [vmem:[%s1205_s3 + $0x20] sm:$0xff]  }
  0x14   :  { %807 = vmatprep.subr.bf16.mxu0 %v922_v20  ;;  %v962_v0 = vld [vmem:[%s1205_s3 + $0x18] sm:$0xff]   ;;  %v963_v1 = vld [vmem:[%s1205_s3 + $0x10] sm:$0xff]   ;;  %v964_v2 = vld [vmem:[%s1205_s3 + $0x8] sm:$0xff]  }
  0x15   :  { %828 = vmatpush3.bf16.msra.mxu1 %v921_v19  ;;  %v965_v3 = vld [vmem:[%s1205_s3] sm:$0xff]  }
  0x16   :  { %829 = vmatprep.subr.bf16.mxu1 %v924_v22  ;;  %v730_v17 = vld [vmem:[%s1206_s2] ss:$0 sm:$0xff] }
  0x17   :  { %808 = vmatpush3.bf16.msra.mxu0 %v923_v21 }
  0x18   :  { %809 = vmatprep.subr.bf16.mxu0 %v926_v24 }
  0x19   :  { %830 = vmatpush3.bf16.msra.mxu1 %v925_v23 }
  0x1a   :  { %831 = vmatprep.subr.bf16.mxu1 %v928_v26 }
  0x1b   :  { %810 = vmatpush3.bf16.msra.mxu0 %v927_v25 }
  0x1c   :  { %811 = vmatprep.subr.bf16.mxu0 %v930_v28 }
  0x1d   :  { %832 = vmatpush3.bf16.msra.mxu1 %v929_v27 }
  0x1e   :  { %833 = vmatprep.subr.bf16.mxu1 %v932_v30  ;;  %v788_v30 = vld [vmem:[%s1207_s4] ss:$0 sm:$0xff] }
  0x1f   :  { %812 = vmatpush3.bf16.msra.mxu0 %v931_v29 }
  0x20   :  { %841 = vmatprep.subr.bf16.mxu0 %v937_v35 }
  0x21   :  { %834 = vmatpush3.bf16.msra.mxu1 %v936_v34 }
  0x22   :  { %485 = vmatmul.mubr.bf16.vlgmr.msra.gmra.mxu0 %v731_v32  ;;  %874 = vmatprep.subr.bf16.mxu1 %v966_v41 }
  0x23   :  { %842 = vmatpush3.bf16.msra.mxu0 %v940_v39  ;;  %564 = vmatprep.mubr.bf16.mxu0 %v736_v53 }
  0x24   :  { %525 = vmatmul.mubr.bf16.vlgmr.msra.gmra.mxu1 %v733_v37  ;;  %843 = vmatprep.subr.bf16.mxu0 %v941_v40 }
  0x25   :  { %876 = vmatprep.mubr.msk.bf16.mxu1 %vm967_vm0, %v966_v41  ;;  %875 = vmatpush3.bf16.msra.mxu1 %v955_v50 }
  0x26   :  { %880 = vmatprep.subr.bf16.mxu1 %v966_v41 }
  0x27   :  { %844 = vmatpush3.bf16.msra.mxu0 %v942_v42 }
  0x28   :  { %845 = vmatprep.subr.bf16.mxu0 %v943_v43 }
  0x2b   :  { %846 = vmatpush3.bf16.msra.mxu0 %v944_v44 }
  0x2c   :  { %847 = vmatprep.subr.bf16.mxu0 %v945_v45  ;;  %877 = vmatmul.mubr.msk.bf16.vlgmr.msra.gmra.mxu1 %vm448_vm1, %v935_v52 }
  0x2d   :  { %896 = vmatprep.mubr.msk.bf16.mxu1 %vm967_vm0, %v966_v41  ;;  %881 = vmatpush3.bf16.msra.mxu1 %v958_v60 }
  0x2e   :  { %882 = vmatprep.subr.bf16.mxu1 %v966_v41 }
  0x2f   :  { %848 = vmatpush3.bf16.msra.mxu0 %v946_v46 }
  0x30   :  { %849 = vmatprep.subr.bf16.mxu0 %v947_v47 }
  0x31   :  { %883 = vmatpush3.bf16.msra.mxu1 %v959_v61 }
  0x32   :  { %884 = vmatprep.subr.bf16.mxu1 %v966_v41 }
  0x33   :  { %850 = vmatpush3.bf16.msra.mxu0 %v948_v48 }
  0x34   :  { %851 = vmatprep.subr.bf16.mxu0 %v949_v49 }
  0x35   :  { %885 = vmatpush3.bf16.msra.mxu1 %v960_v62 }
  0x36   :  { %886 = vmatprep.subr.bf16.mxu1 %v966_v41 }
  0x37   :  { %852 = vmatpush3.bf16.msra.mxu0 %v950_v54 }
  0x38   :  { %853 = vmatprep.subr.bf16.mxu0 %v951_v55 }
  0x39   :  { %887 = vmatpush3.bf16.msra.mxu1 %v961_v63 }
  0x3a   :  { %888 = vmatprep.subr.bf16.mxu1 %v966_v41 }
  0x3b   :  { %854 = vmatpush3.bf16.msra.mxu0 %v952_v56 }
  0x3c   :  { %855 = vmatprep.subr.bf16.mxu0 %v953_v57 }
  0x3d   :  { %889 = vmatpush3.bf16.msra.mxu1 %v962_v0 }
  0x3e   :  { %890 = vmatprep.subr.bf16.mxu1 %v966_v41 }
  0x3f   :  { %856 = vmatpush3.bf16.msra.mxu0 %v954_v58 }
  0x41   :  { %891 = vmatpush3.bf16.msra.mxu1 %v963_v1 }
  0x42   :  { %565 = vmatmul.mubr.bf16.vlgmr.msra.gmra.mxu0 %v735_v59  ;;  %892 = vmatprep.subr.bf16.mxu1 %v966_v41 }
  0x45   :  { %893 = vmatpush3.bf16.msra.mxu1 %v964_v2 }
  0x46   :  { %894 = vmatprep.subr.bf16.mxu1 %v966_v41 }
  0x49   :  { %895 = vmatpush3.bf16.msra.mxu1 %v965_v3 }
  0xe2   :  { %v813_v4 = vpop.f32.mrf.mxu0 }
  0xe4   :  { %v814_v5 = vpop.f32.mrf.mxu0  ;;  %v835_v6 = vpop.f32.mrf.mxu1 }
  0xe5   :  { %v815_v16 = vadd.f32 %v814_v5, %v813_v4 }
  0xe6   :  { %v816_v7 = vpop.f32.mrf.mxu0  ;;  %v836_v8 = vpop.f32.mrf.mxu1 }
  0xe7   :  { %v487_v18 = vadd.f32 %v815_v16, %v730_v17  ;;  %v837_v19 = vadd.f32 %v836_v8, %v835_v6 }
  0xe8   :  { %v817_v9 = vpop.f32.mrf.mxu0  ;;  %v838_v10 = vpop.f32.mrf.mxu1 }
  0xe9   :  { %v527_v22 = vadd.f32 %v837_v19, %v487_v18 }
  0xea   :  { %v839_v11 = vpop.f32.mrf.mxu1 }
  0xec   :  { %v606_v12 = vpop.f32.mrf.mxu1 }
  0xee   :  { %v878_v13 = vpop.f32.mrf.mxu1 }
  0xf0   :  { %v609_v14 = vpop.f32.mrf.mxu1 }
  0xf2   :  { %v879_v15 = vpop.f32.mrf.mxu1 }
 0x102   :  { %v857_v20 = vpop.f32.mrf.mxu0 }
 0x104   :  { %v858_v21 = vpop.f32.mrf.mxu0 }
 0x105   :  { %v859_v23 = vadd.f32 %v858_v21, %v857_v20 }
 0x106   :  { %v860_v24 = vpop.f32.mrf.mxu0 }
 0x107   :  { %v567_v25 = vadd.f32 %v859_v23, %v527_v22 }
 0x108   :  { %v861_v26 = vpop.f32.mrf.mxu0 }
 0x109   :  { %v607_v27 = vadd.f32 %v606_v12, %v567_v25 }
 0x10b   :  { %v612_v28 = vmax.f32 %v607_v27, 0.0 }
 0x10d   :  { %v613_v29 = vpack.c.bf16 %v612_v28, %v612_v28 }
 0x10f   :  { %897 = vmatmul.mubr.bf16.vlgmr.msra.gmra.mxu1 %v613_v29 }
 0x1cf   :  { %v719_v31 = vpop.f32.mrf.mxu1 }
 0x1d0   :  { %v720_v32 = vadd.f32 %v788_v30, %v719_v31 }
 0x1d1   :  { %v898_v33 = vpop.f32.mrf.mxu1 }
 0x1d2   :  { %725 = vst [vmem:[%s1208_s5] sm:$0xff] %v720_v32 }
 0x1d3   :  { %v722_v34 = vpop.f32.mrf.mxu1 }
 0x1d5   :  { %v899_v35 = vpop.f32.mrf.mxu1 }

</bundles_post_ra>
